<compile_context>
chip_gen: v7x
topology: tpu7x:2x2x1
jax: 0.10.0
libtpu: 0.0.40
codegen_flags: <defaults>
</compile_context>

<pallas_src>
import functools
import math

import jax
import jax.numpy as jnp
from jax.experimental import pallas as pl
from jax.experimental.pallas import tpu as pltpu

LANE = 128            # TPU lane width: output padded to a multiple of this.
NEG_BIG = -1e30       # Finite "-inf" for padded logit lanes (exp underflows to 0).
MAX_ROWS_PER_STEP = 1024   # Batch-tile cap (keeps VMEM tiny even on v7x's 64 MiB).


def actor_kernel(x_ref, w1t_ref, b1_ref, w2t_ref, b2_ref, w3t_ref, b3_ref, o_ref):
    """Fused 3-layer MLP + softmax on one (TB, S) batch tile.

    x_ref   : (TB, S)      states
    w1t_ref : (S,  H)      Linear1 weight, pre-transposed
    b1_ref  : (1,  H)
    w2t_ref : (H,  H)      Linear2 weight, pre-transposed
    b2_ref  : (1,  H)
    w3t_ref : (H,  Apad)   Linear3 weight, pre-transposed, zero-padded to 128 lanes
    b3_ref  : (1,  Apad)   bias, padded lanes hold -1e30
    o_ref   : (TB, Apad)   softmax probabilities (padded lanes come out as 0)
    """
    x = x_ref[...]

    # Layer 1: Linear + ReLU (MXU matmul, f32 accumulation; VPU bias/relu).
    h1 = jnp.dot(x, w1t_ref[...], preferred_element_type=jnp.float32) + b1_ref[...]
    h1 = jnp.maximum(h1, 0.0)

    # Layer 2: Linear + ReLU.
    h2 = jnp.dot(h1, w2t_ref[...], preferred_element_type=jnp.float32) + b2_ref[...]
    h2 = jnp.maximum(h2, 0.0)

    # Layer 3: Linear -> lane-dense logits.  Padded lanes = 0 + (-1e30) = -1e30.
    logits = jnp.dot(h2, w3t_ref[...], preferred_element_type=jnp.float32) + b3_ref[...]

    # Numerically-stable softmax over the last (lane) axis.  Padded lanes
    # underflow to exactly 0 and do not perturb the max or the denominator.
    m = jnp.max(logits, axis=-1, keepdims=True)
    e = jnp.exp(logits - m)                      # EUP
    denom = jnp.sum(e, axis=-1, keepdims=True)   # XLU reduce
    o_ref[...] = (e / denom).astype(o_ref.dtype)


def init_params(key, state_dim, hidden_dim, action_dim):
    """Deterministic init mimicking PyTorch nn.Linear U(-1/sqrt(fan_in), 1/sqrt(fan_in)).

    Returns PyTorch-layout params: W (out, in), b (out,).
    """
    ks = jax.random.split(key, 6)

    k1 = 1.0 / math.sqrt(state_dim)
    w1 = jax.random.uniform(ks[0], (hidden_dim, state_dim), jnp.float32, -k1, k1)
    b1 = jax.random.uniform(ks[1], (hidden_dim,), jnp.float32, -k1, k1)

    k2 = 1.0 / math.sqrt(hidden_dim)
    w2 = jax.random.uniform(ks[2], (hidden_dim, hidden_dim), jnp.float32, -k2, k2)
    b2 = jax.random.uniform(ks[3], (hidden_dim,), jnp.float32, -k2, k2)

    k3 = 1.0 / math.sqrt(hidden_dim)
    w3 = jax.random.uniform(ks[4], (action_dim, hidden_dim), jnp.float32, -k3, k3)
    b3 = jax.random.uniform(ks[5], (action_dim,), jnp.float32, -k3, k3)

    return w1, b1, w2, b2, w3, b3


def prepare_params(params):
    """One-time prep: transpose weights, reshape biases, pad layer-3 to 128 lanes."""
    w1, b1, w2, b2, w3, b3 = params
    H, S = w1.shape
    A = w3.shape[0]
    a_pad = pl.cdiv(A, LANE) * LANE

    w1t = jnp.transpose(w1, (1, 0)).astype(jnp.float32)            # (S, H)
    w2t = jnp.transpose(w2, (1, 0)).astype(jnp.float32)            # (H, H)

    w3t_pad = jnp.zeros((H, a_pad), jnp.float32).at[:, :A].set(jnp.transpose(w3, (1, 0)))
    b3_pad = jnp.full((1, a_pad), NEG_BIG, jnp.float32).at[0, :A].set(b3)

    prepared = (w1t, b1.reshape(1, H).astype(jnp.float32),
                w2t, b2.reshape(1, H).astype(jnp.float32),
                w3t_pad, b3_pad)
    return prepared, A


@functools.partial(jax.jit, static_argnames=("action_dim",))
def actor_forward(state, prepared, action_dim):
    """state: (B, state_dim) -> softmax probabilities (B, action_dim)."""
    w1t, b1, w2t, b2, w3t_pad, b3_pad = prepared
    B, S = state.shape
    H = w1t.shape[1]
    a_pad = w3t_pad.shape[1]

    # Batch tiling: one grid step for small/medium batches, big tiles otherwise.
    if B <= MAX_ROWS_PER_STEP:
        tb = B
        b_pad = B
    else:
        tb = MAX_ROWS_PER_STEP
        b_pad = pl.cdiv(B, tb) * tb
    if b_pad != B:
        state = jnp.pad(state, ((0, b_pad - B), (0, 0)))

    grid = (b_pad // tb,)

    out = pl.pallas_call(
        actor_kernel,
        out_shape=jax.ShapeDtypeStruct((b_pad, a_pad), jnp.float32),
        grid=grid,
        in_specs=[
            pl.BlockSpec((tb, S), lambda i: (i, 0)),       # states: tiled over batch
            pl.BlockSpec((S, H), lambda i: (0, 0)),        # W1^T (shared by all tiles)
            pl.BlockSpec((1, H), lambda i: (0, 0)),        # b1
            pl.BlockSpec((H, H), lambda i: (0, 0)),        # W2^T
            pl.BlockSpec((1, H), lambda i: (0, 0)),        # b2
            pl.BlockSpec((H, a_pad), lambda i: (0, 0)),    # W3^T, lane-padded
            pl.BlockSpec((1, a_pad), lambda i: (0, 0)),    # b3,   lane-padded
        ],
        out_specs=pl.BlockSpec((tb, a_pad), lambda i: (i, 0)),
        compiler_params=pltpu.CompilerParams(
            dimension_semantics=("parallel",),
        ),
    )(state, w1t, b1, w2t, b2, w3t_pad, b3_pad)

    return out[:B, :action_dim]


def actor_reference(state, params):
    """Pure-JAX reference replicating the PyTorch Actor.forward exactly."""
    w1, b1, w2, b2, w3, b3 = params
    h1 = jax.nn.relu(state @ w1.T + b1)
    h2 = jax.nn.relu(h1 @ w2.T + b2)
    logits = h2 @ w3.T + b3
    return jax.nn.softmax(logits, axis=-1)


if __name__ == "__main__":
    state_dim = 12
    hidden_dim = 32
    action_dim = 6
    batch = 16

    key = jax.random.PRNGKey(0)
    k_param, k_x = jax.random.split(key)
    params = init_params(k_param, state_dim, hidden_dim, action_dim)
    prepared, A = prepare_params(params)

    state = jax.random.normal(k_x, (batch, state_dim), dtype=jnp.float32)

    probs = actor_forward(state, prepared, A)
    probs = jax.block_until_ready(probs)

    probs_ref = jax.block_until_ready(actor_reference(state, params))

    assert probs.shape == (batch, action_dim)
    assert jnp.allclose(probs, probs_ref, rtol=1e-5, atol=1e-5), (probs, probs_ref)
    # Rows must be valid probability distributions.
    assert jnp.allclose(jnp.sum(probs, axis=-1), 1.0, rtol=1e-5, atol=1e-5)
    assert bool(jnp.all(probs >= 0.0))

    print("KERNEL_OK")
</pallas_src>

<mosaic_0001>
module attributes {stable_mosaic.version = 11 : i64} {
  func.func @actor_kernel(%arg0: i32, %arg1: memref<16x12xf32, #tpu.memory_space<vmem>>, %arg2: memref<12x32xf32, #tpu.memory_space<vmem>>, %arg3: memref<1x32xf32, #tpu.memory_space<vmem>>, %arg4: memref<32x32xf32, #tpu.memory_space<vmem>>, %arg5: memref<1x32xf32, #tpu.memory_space<vmem>>, %arg6: memref<32x128xf32, #tpu.memory_space<vmem>>, %arg7: memref<1x128xf32, #tpu.memory_space<vmem>>, %arg8: memref<16x128xf32, #tpu.memory_space<vmem>>) attributes {dimension_semantics = [#tpu.dimension_semantics<parallel>], iteration_bounds = array<i64: 1>, scalar_prefetch = 0 : i64, scratch_operands = 0 : i64, tpu.core_type = #tpu.core_type<tc>, window_params = [{transform_indices = @transform_0, window_bounds = array<i64: 16, 12>}, {pipeline_mode = #tpu.pipeline_mode<synchronous>, transform_indices = @transform_1, window_bounds = array<i64: 12, 32>}, {pipeline_mode = #tpu.pipeline_mode<synchronous>, transform_indices = @transform_2, window_bounds = array<i64: 1, 32>}, {pipeline_mode = #tpu.pipeline_mode<synchronous>, transform_indices = @transform_3, window_bounds = array<i64: 32, 32>}, {pipeline_mode = #tpu.pipeline_mode<synchronous>, transform_indices = @transform_4, window_bounds = array<i64: 1, 32>}, {pipeline_mode = #tpu.pipeline_mode<synchronous>, transform_indices = @transform_5, window_bounds = array<i64: 32, 128>}, {pipeline_mode = #tpu.pipeline_mode<synchronous>, transform_indices = @transform_6, window_bounds = array<i64: 1, 128>}, {transform_indices = @transform_7, window_bounds = array<i64: 16, 128>}]} {
    %c0 = arith.constant 0 : index
    %c0_0 = arith.constant 0 : index
    %0 = vector.load %arg1[%c0, %c0_0] : memref<16x12xf32, #tpu.memory_space<vmem>>, vector<16x12xf32>
    %c0_1 = arith.constant 0 : index
    %c0_2 = arith.constant 0 : index
    %1 = vector.load %arg2[%c0_1, %c0_2] : memref<12x32xf32, #tpu.memory_space<vmem>>, vector<12x32xf32>
    %cst = arith.constant dense<0.000000e+00> : vector<16x32xf32>
    %2 = tpu.matmul %0, %1, %cst {dimension_numbers = #tpu.dot_dimension_numbers<[1], [0], [0], [1], [0, 0, 1, 1], [], []>} : vector<16x12xf32>, vector<12x32xf32>, vector<16x32xf32> -> vector<16x32xf32>
    %c0_3 = arith.constant 0 : index
    %c0_4 = arith.constant 0 : index
    %3 = vector.load %arg3[%c0_3, %c0_4] : memref<1x32xf32, #tpu.memory_space<vmem>>, vector<1x32xf32>
    %4 = vector.broadcast %3 : vector<1x32xf32> to vector<16x32xf32>
    %5 = arith.addf %2, %4 : vector<16x32xf32>
    %cst_5 = arith.constant 0.000000e+00 : f32
    %6 = vector.broadcast %cst_5 : f32 to vector<16x32xf32>
    %7 = arith.maximumf %5, %6 : vector<16x32xf32>
    %c0_6 = arith.constant 0 : index
    %c0_7 = arith.constant 0 : index
    %8 = vector.load %arg4[%c0_6, %c0_7] : memref<32x32xf32, #tpu.memory_space<vmem>>, vector<32x32xf32>
    %cst_8 = arith.constant dense<0.000000e+00> : vector<16x32xf32>
    %9 = tpu.matmul %7, %8, %cst_8 {dimension_numbers = #tpu.dot_dimension_numbers<[1], [0], [0], [1], [0, 0, 1, 1], [], []>} : vector<16x32xf32>, vector<32x32xf32>, vector<16x32xf32> -> vector<16x32xf32>
    %c0_9 = arith.constant 0 : index
    %c0_10 = arith.constant 0 : index
    %10 = vector.load %arg5[%c0_9, %c0_10] : memref<1x32xf32, #tpu.memory_space<vmem>>, vector<1x32xf32>
    %11 = vector.broadcast %10 : vector<1x32xf32> to vector<16x32xf32>
    %12 = arith.addf %9, %11 : vector<16x32xf32>
    %cst_11 = arith.constant 0.000000e+00 : f32
    %13 = vector.broadcast %cst_11 : f32 to vector<16x32xf32>
    %14 = arith.maximumf %12, %13 : vector<16x32xf32>
    %c0_12 = arith.constant 0 : index
    %c0_13 = arith.constant 0 : index
    %15 = vector.load %arg6[%c0_12, %c0_13] : memref<32x128xf32, #tpu.memory_space<vmem>>, vector<32x128xf32>
    %cst_14 = arith.constant dense<0.000000e+00> : vector<16x128xf32>
    %16 = tpu.matmul %14, %15, %cst_14 {dimension_numbers = #tpu.dot_dimension_numbers<[1], [0], [0], [1], [0, 0, 1, 1], [], []>} : vector<16x32xf32>, vector<32x128xf32>, vector<16x128xf32> -> vector<16x128xf32>
    %c0_15 = arith.constant 0 : index
    %c0_16 = arith.constant 0 : index
    %17 = vector.load %arg7[%c0_15, %c0_16] : memref<1x128xf32, #tpu.memory_space<vmem>>, vector<1x128xf32>
    %18 = vector.broadcast %17 : vector<1x128xf32> to vector<16x128xf32>
    %19 = arith.addf %16, %18 : vector<16x128xf32>
    %cst_17 = arith.constant dense<0xFF800000> : vector<16xf32>
    %20 = vector.multi_reduction <maximumf>, %19, %cst_17 [1] : vector<16x128xf32> to vector<16xf32>
    %21 = vector.shape_cast %20 : vector<16xf32> to vector<16x1xf32>
    %22 = vector.broadcast %21 : vector<16x1xf32> to vector<16x128xf32>
    %23 = arith.subf %19, %22 : vector<16x128xf32>
    %24 = math.exp %23 : vector<16x128xf32>
    %cst_18 = arith.constant dense<0.000000e+00> : vector<16xf32>
    %25 = vector.multi_reduction <add>, %24, %cst_18 [1] : vector<16x128xf32> to vector<16xf32>
    %26 = vector.shape_cast %25 : vector<16xf32> to vector<16x1xf32>
    %27 = vector.broadcast %26 : vector<16x1xf32> to vector<16x128xf32>
    %28 = arith.divf %24, %27 : vector<16x128xf32>
    %c0_19 = arith.constant 0 : index
    %c0_20 = arith.constant 0 : index
    %29 = vector.load %arg8[%c0_19, %c0_20] : memref<16x128xf32, #tpu.memory_space<vmem>>, vector<16x128xf32>
    tpu.vector_store %arg8[%c0_19, %c0_20], %28 {strides = array<i32>} : memref<16x128xf32, #tpu.memory_space<vmem>>, vector<16x128xf32>,
    return
  }
  func.func @transform_0(%arg0: i32) -> (i32, i32) {
    %c0_i32 = arith.constant 0 : i32
    %c0_i32_0 = arith.constant 0 : i32
    return %arg0, %c0_i32 : i32, i32
  }
  func.func @transform_1(%arg0: i32) -> (i32, i32) {
    %c0_i32 = arith.constant 0 : i32
    %c0_i32_0 = arith.constant 0 : i32
    %c0_i32_1 = arith.constant 0 : i32
    return %c0_i32, %c0_i32_0 : i32, i32
  }
  func.func @transform_2(%arg0: i32) -> (i32, i32) {
    %c0_i32 = arith.constant 0 : i32
    %c0_i32_0 = arith.constant 0 : i32
    %c0_i32_1 = arith.constant 0 : i32
    return %c0_i32, %c0_i32_0 : i32, i32
  }
  func.func @transform_3(%arg0: i32) -> (i32, i32) {
    %c0_i32 = arith.constant 0 : i32
    %c0_i32_0 = arith.constant 0 : i32
    %c0_i32_1 = arith.constant 0 : i32
    return %c0_i32, %c0_i32_0 : i32, i32
  }
  func.func @transform_4(%arg0: i32) -> (i32, i32) {
    %c0_i32 = arith.constant 0 : i32
    %c0_i32_0 = arith.constant 0 : i32
    %c0_i32_1 = arith.constant 0 : i32
    return %c0_i32, %c0_i32_0 : i32, i32
  }
  func.func @transform_5(%arg0: i32) -> (i32, i32) {
    %c0_i32 = arith.constant 0 : i32
    %c0_i32_0 = arith.constant 0 : i32
    %c0_i32_1 = arith.constant 0 : i32
    return %c0_i32, %c0_i32_0 : i32, i32
  }
  func.func @transform_6(%arg0: i32) -> (i32, i32) {
    %c0_i32 = arith.constant 0 : i32
    %c0_i32_0 = arith.constant 0 : i32
    %c0_i32_1 = arith.constant 0 : i32
    return %c0_i32, %c0_i32_0 : i32, i32
  }
  func.func @transform_7(%arg0: i32) -> (i32, i32) {
    %c0_i32 = arith.constant 0 : i32
    %c0_i32_0 = arith.constant 0 : i32
    return %arg0, %c0_i32 : i32, i32
  }
}

</mosaic_0001>

<bundles_post_ra>
// kernel: actor_forward.1
= control target key start
LH: loop header
LB: loop body
LE: loop exit
PB: predicated region body
PF: predicated region fallthrough
CT: control target
= control target key end

     0   :  { %12 = vsyncpa [#allocation3], 0  ;;  %s722_s0 = inlined_call_operand.hbm [shape: f32[16,12], index: 0, kind: input, shape index: {}]   ;;  %s723_s1 = inlined_call_operand.hbm [shape: f32[12,32], index: 1, kind: input, shape index: {}]   ;;  %s724_s2 = inlined_call_operand.vmem [shape: f32[1,32], index: 2, kind: input, shape index: {}]   ;;  %s725_s3 = inlined_call_operand.hbm [shape: f32[32,32], index: 3, kind: input, shape index: {}]   ;;  %s726_s4 = inlined_call_operand.vmem [shape: f32[1,32], index: 4, kind: input, shape index: {}]   ;;  %s727_s5 = inlined_call_operand.hbm [shape: f32[32,128], index: 5, kind: input, shape index: {}]   ;;  %s728_s6 = inlined_call_operand.vmem [shape: f32[1,128], index: 6, kind: input, shape index: {}]   ;;  %s729_s7 = inlined_call_operand.vmem [shape: f32[16,128], index: 7, kind: output, shape index: {}]  }
   0x1   :  { %13 = vsyncpa [#allocation5], 0 }
   0x2   :  { %14 = vsyncpa [#allocation8], 0  ;;  %s580_s24 = smov [#allocation4]   ;;  %s581_s26 = smov [#allocation2]  }
   0x3   :  { %s32_s25 = sshll.u32 %s580_s24, 4  ;;  %s20_s27 = sshll.u32 %s581_s26, 4  ;;  %s33_s25 = int_to_ptr.vmem [resolvable:$true] %s32_s25  ;;  %s627_s27 = int_to_ptr.vmem [resolvable:$true] %s20_s27 }
   0x4   :  { %s486_s30 = scalar_lea.hbm %s723_s1, 256 }
   0x5   :  { %p487_p0 = scmp.ne.s32.totalorder %s723_s1, %s486_s30  ;;  %p490_p1 = scmp.lt.u32.totalorder %s486_s30, %s723_s1 }
   0x7   :  { %p492_p2 = pnand %p490_p1, %p487_p0 }
   0x9   :  { %495 = shalt.err (!%p492_p2)
}
   0xa   :  { %s496_s12 = scalar_lea.vmem %s33_s25, 256  ;;  %p501_p4 = scmp.lt.s32.totalorder %s33_s25, %s33_s25 }
   0xb   :  { %p497_p3 = scmp.ne.s32.totalorder %s33_s25, %s496_s12  ;;  %p502_p5 = scmp.lt.s32.totalorder %s496_s12, %s496_s12 }
   0xd   :  { %p503_p6 = por %p502_p5, %p501_p4 }
   0xf   :  { %p504_p7 = pnand %p503_p6, %p497_p3 }
  0x11   :  { %507 = shalt.err (!%p504_p7)
}
  0x12   :  { %s582_s13 = smov 128   ;;  %s583_s14 = smov 8  }
  0x13   :  { %38 = dma.hbm_to_vmem [thread:$0]  %s723_s1, 256, %s33_s25, [#allocation5], %s582_s13, %s582_s13, %s583_s14  }
  0x14   :  { %s508_s19 = scalar_lea.hbm %s722_s0, 256 }
  0x15   :  { %p509_p8 = scmp.ne.s32.totalorder %s722_s0, %s508_s19  ;;  %p512_p9 = scmp.lt.u32.totalorder %s508_s19, %s722_s0 }
  0x17   :  { %p514_p10 = pnand %p512_p9, %p509_p8 }
  0x19   :  { %517 = shalt.err (!%p514_p10)
}
  0x1a   :  { %s518_s24 = scalar_lea.vmem %s627_s27, 256  ;;  %p523_p12 = scmp.lt.s32.totalorder %s627_s27, %s627_s27 }
  0x1b   :  { %p519_p11 = scmp.ne.s32.totalorder %s627_s27, %s518_s24  ;;  %p524_p13 = scmp.lt.s32.totalorder %s518_s24, %s518_s24 }
  0x1d   :  { %p525_p0 = por %p524_p13, %p523_p12 }
  0x1f   :  { %p526_p1 = pnand %p525_p0, %p519_p11 }
  0x21   :  { %529 = shalt.err (!%p526_p1)
}
  0x22   :  { %26 = dma.hbm_to_vmem [thread:$0]  %s722_s0, 256, %s627_s27, [#allocation3], %s582_s13, %s582_s13, %s583_s14  }
  0x23   :  { %s584_s26 = smov [#allocation6]   ;;  %s585_s29 = smov [#allocation7]  }
  0x24   :  { %s46_s28 = sshll.u32 %s584_s26, 4  ;;  %s60_s30 = sshll.u32 %s585_s29, 4  ;;  %s47_s28 = int_to_ptr.vmem [resolvable:$true] %s46_s28  ;;  %s664_s30 = int_to_ptr.vmem [resolvable:$true] %s60_s30 }
  0x25   :  { %s530_s10 = scalar_lea.hbm %s725_s3, 512 }
  0x26   :  { %p531_p2 = scmp.ne.s32.totalorder %s725_s3, %s530_s10  ;;  %p534_p3 = scmp.lt.u32.totalorder %s530_s10, %s725_s3 }
  0x28   :  { %p536_p4 = pnand %p534_p3, %p531_p2 }
  0x2a   :  { %539 = shalt.err (!%p536_p4)
}
  0x2b   :  { %s540_s0 = scalar_lea.vmem %s47_s28, 512  ;;  %p545_p6 = scmp.lt.s32.totalorder %s47_s28, %s47_s28 }
  0x2c   :  { %p541_p5 = scmp.ne.s32.totalorder %s47_s28, %s540_s0  ;;  %p546_p7 = scmp.lt.s32.totalorder %s540_s0, %s540_s0 }
  0x2e   :  { %p547_p8 = por %p546_p7, %p545_p6 }
  0x30   :  { %p548_p9 = pnand %p547_p8, %p541_p5 }
  0x32   :  { %551 = shalt.err (!%p548_p9)
}
  0x33   :  { %52 = dma.hbm_to_vmem [thread:$0]  %s725_s3, 512, %s47_s28, [#allocation5], %s582_s13, %s582_s13, %s583_s14  }
  0x34   :  { %s552_s20 = scalar_lea.hbm %s727_s5, 512 }
  0x35   :  { %p553_p10 = scmp.ne.s32.totalorder %s727_s5, %s552_s20  ;;  %p556_p11 = scmp.lt.u32.totalorder %s552_s20, %s727_s5 }
  0x37   :  { %p558_p12 = pnand %p556_p11, %p553_p10 }
  0x39   :  { %561 = shalt.err (!%p558_p12)
}
  0x3a   :  { %s562_s1 = scalar_lea.vmem %s664_s30, 512  ;;  %p567_p0 = scmp.lt.s32.totalorder %s664_s30, %s664_s30 }
  0x3b   :  { %p563_p13 = scmp.ne.s32.totalorder %s664_s30, %s562_s1  ;;  %p568_p1 = scmp.lt.s32.totalorder %s562_s1, %s562_s1 }
  0x3d   :  { %p569_p2 = por %p568_p1, %p567_p0 }
  0x3f   :  { %p570_p3 = pnand %p569_p2, %p563_p13 }
  0x41   :  { %573 = shalt.err (!%p570_p3)
}
  0x42   :  { %66 = dma.hbm_to_vmem [thread:$0]  %s727_s5, 512, %s664_s30, [#allocation8], %s582_s13, %s582_s13, %s583_s14  }
  0x43   :  { %574 = dma.done.wait [#allocation3], 256  }
  0x44   :  { %575 = vsyncadd [#allocation3], 4294967040 }
  0x45   :  { %576 = dma.done.wait [#allocation5], 768  }
  0x46   :  { %577 = vsyncadd [#allocation5], 4294966528 }
  0x47   :  { %578 = dma.done.wait [#allocation8], 512  }
  0x48   :  { %579 = vsyncadd [#allocation8], 4294966784  ;;  %vm99_vm0 = vcmask 1043456   ;;  %vm92_vm1 = vcmask 97280   ;;  %vm586_vm2 = vmmov 1   ;;  %v83_v0 = vld [vmem:[#allocation4] sm:$0xff] }
  0x49   :  { %vm450_vm3 = vmpackc.low %vm99_vm0, %vm586_vm2  ;;  %v84_v1 = vld [vmem:[#allocation4 + $0x8] sm:$0xf]  ;;  %v81_v2 = vld [vmem:[#allocation2] sm:$0xff]  ;;  %vm191_vm4 = vcmask 261120  }
  0x4a   :  { %v449_v3 = vpack.c.bf16 %v84_v1, %v83_v0  ;;  %424 = vmatprep.mubr.msk.f32.mxu0 %vm92_vm1, %v81_v2  ;;  %v180_v4 = vld [vmem:[#allocation6] sm:$0xff]  ;;  %v181_v5 = vld [vmem:[#allocation6 + $0x8] sm:$0xff]  ;;  %v182_v8 = vld [vmem:[#allocation6 + $0x10] sm:$0xff] }
  0x4b   :  { %v455_v6 = vpack.c.bf16 %v181_v5, %v180_v4  ;;  %v82_v7 = vld [vmem:[#allocation2 + $0x8] sm:$0xff]  ;;  %v183_v9 = vld [vmem:[#allocation6 + $0x18] sm:$0xff]  ;;  %v275_v11 = vld [vmem:[#allocation7] sm:$0xff] }
  0x4c   :  { %451 = vmatprep.subr.msk.bf16.mxu0 %vm450_vm3, %v449_v3  ;;  %v459_v10 = vpack.c.bf16 %v183_v9, %v182_v8  ;;  %v276_v12 = vld [vmem:[#allocation7 + $0x8] sm:$0xff]  ;;  %v394_v14 = vld [vmem:[%s724_s2] ss:$0 sm:$0xff]  ;;  %v277_v21 = vld [vmem:[#allocation7 + $0x10] sm:$0xff] }
  0x4d   :  { %454 = vmatpush3.bf16.msk.msra.mxu0 %vm450_vm3, %v449_v3  ;;  %456 = vmatprep.subr.bf16.mxu1 %v455_v6  ;;  %v463_v13 = vpack.c.bf16 %v276_v12, %v275_v11  ;;  %v278_v22 = vld [vmem:[#allocation7 + $0x18] sm:$0xff]  ;;  %v398_v24 = vld [vmem:[%s726_s4] ss:$0 sm:$0xff] }
  0x4e   :  { %458 = vmatpush3.bf16.msra.mxu1 %v455_v6  ;;  %v467_v23 = vpack.c.bf16 %v278_v22, %v277_v21  ;;  %v401_v31 = vld [vmem:[%s728_s6] ss:$0 sm:$0xff] }
  0x4f   :  { %460 = vmatprep.subr.bf16.mxu1 %v459_v10  ;;  %464 = vmatprep.subr.bf16.mxu0 %v463_v13 }
  0x50   :  { %425 = vmatmul.mubr.msk.f32.vlgmr.msra.gmra.mrb[0].mxu0 %vm92_vm1, %v82_v7 }
  0x51   :  { %466 = vmatpush3.bf16.msra.mxu0 %v463_v13 }
  0x52   :  { %462 = vmatpush3.bf16.msra.mxu1 %v459_v10  ;;  %468 = vmatprep.subr.bf16.mxu0 %v467_v23 }
  0x55   :  { %470 = vmatpush3.bf16.msra.mxu0 %v467_v23 }
 0x123   :  { %v426_v15 = vpop.f32.mrb[0].mxu0 }
 0x124   :  { %v175_v16 = vadd.f32 %v426_v15, %v394_v14  ;;  %v169_v17 = vpop.f32.mrb[1].mxu0 }
 0x125   :  { %v170_v18 = vadd.f32 %v394_v14, %v169_v17 }
 0x126   :  { %v179_v20 = vmax.f32 %v175_v16, 0.0 }
 0x127   :  { %v178_v19 = vmax.f32 %v170_v18, 0.0 }
 0x129   :  { %435 = vmatprep.mubr.msk.f32.mxu1 %vm191_vm4, %v178_v19 }
 0x12a   :  { %436 = vmatmul.mubr.msk.f32.vlgmr.msra.gmra.mrb[0].mxu1 %vm191_vm4, %v179_v20 }
 0x1fd   :  { %v437_v25 = vpop.f32.mrb[0].mxu1 }
 0x1fe   :  { %v270_v26 = vadd.f32 %v437_v25, %v398_v24  ;;  %v264_v27 = vpop.f32.mrb[1].mxu1 }
 0x1ff   :  { %v265_v28 = vadd.f32 %v398_v24, %v264_v27 }
 0x200   :  { %v274_v30 = vmax.f32 %v270_v26, 0.0 }
 0x201   :  { %v273_v29 = vmax.f32 %v265_v28, 0.0 }
 0x203   :  { %446 = vmatprep.mubr.msk.f32.mxu0 %vm191_vm4, %v273_v29 }
 0x204   :  { %447 = vmatmul.mubr.msk.f32.vlgmr.msra.gmra.mrb[2].mxu0 %vm191_vm4, %v274_v30 }
 0x2d7   :  { %v448_v32 = vpop.f32.mrb[2].mxu0 }
 0x2d8   :  { %v358_v33 = vpop.f32.mrb[3].mxu0  ;;  %v364_v35 = vadd.f32 %v448_v32, %v401_v31 }
 0x2d9   :  { %v359_v34 = vadd.f32 %v401_v31, %v358_v33 }
 0x2db   :  { %367 = vmax.xlane.f32.xlu0 %v359_v34 }
 0x2df   :  { %369 = vmax.xlane.f32.xlu0 %v364_v35 }
 0x368   :  { %v368_v36 = vpop.xlane.xlu0 %367 }
 0x369   :  { %v371_v37 = vsub.f32 %v359_v34, %v368_v36 }
 0x36b   :  { %v373_v38 = vmul.f32 1.442695, %v371_v37 }
 0x36c   :  { %v370_v39 = vpop.xlane.xlu0 %369 }
 0x36d   :  { %478 = vpow2.f32 %v373_v38  ;;  %v372_v40 = vsub.f32 %v364_v35, %v370_v39 }
 0x36f   :  { %v375_v41 = vmul.f32 1.442695, %v372_v40 }
 0x371   :  { %480 = vpow2.f32 %v375_v41 }
 0x377   :  { %v479_v42 = vpop.eup %478 }
 0x378   :  { %377 = vadd.xlane.f32.xlu1 %v479_v42 }
 0x37b   :  { %v481_v43 = vpop.eup %480 }
 0x37c   :  { %379 = vadd.xlane.f32.xlu1 %v481_v43 }
 0x405   :  { %v378_v44 = vpop.xlane.xlu1 %377 }
 0x406   :  { %482 = vrcp.f32 %v378_v44 }
 0x409   :  { %v380_v45 = vpop.xlane.xlu1 %379 }
 0x40a   :  { %484 = vrcp.f32 %v380_v45 }
 0x410   :  { %v483_v46 = vpop.eup %482 }
 0x411   :  { %v382_v47 = vmul.f32 %v483_v46, %v479_v42 }
 0x413   :  { %385 = vst [vmem:[%s729_s7] sm:$0xff] %v382_v47 }
 0x414   :  { %v485_v48 = vpop.eup %484 }
 0x415   :  { %v384_v49 = vmul.f32 %v485_v48, %v481_v43 }
 0x417   :  { %386 = vst [vmem:[%s729_s7 + $0x8] sm:$0xff] %v384_v49 }
 0x418   :  { %391 = vsyncpa [#allocation3], 1 }
 0x419   :  { %392 = vsyncpa [#allocation5], 1 }
 0x41a   :  { %393 = vsyncpa [#allocation8], 1 }

</bundles_post_ra>
